<compile_context>
chip_gen: v6e
topology: v6e:2x2x1
jax: 0.10.0
libtpu: 0.0.40
codegen_flags: <defaults>
</compile_context>

<pallas_src>
import functools

import jax
import jax.numpy as jnp
from jax import lax
from jax.experimental import pallas as pl
from jax.experimental.pallas import tpu as pltpu

LANES = 128
SUBLANES = 8
DEFAULT_BLOCK_ROWS = 4096   # (4096, 128) f32 = 2 MiB per input per buffer
CHUNK_ROWS = 512            # in-kernel sub-chunk (256 KiB f32 temporaries)
SMALL_ROWS = 256            # <= this many rows: single full-extent block


def _round_up(x, m):
    return ((x + m - 1) // m) * m


def _focal_loss_kernel(x_ref, t_ref, o_ref, *, gamma, chunk_rows, n_chunks,
                       num_blocks, rem_rows, binary_targets):
    """One (br, 128) block -> (8, 128) partial sum, chunked over sub-tiles."""
    zero_acc = jnp.zeros((SUBLANES, LANES), jnp.float32)

    def chunk_loss(x, t):
        x = x.astype(jnp.float32)
        t = t.astype(jnp.float32)
        if binary_targets:
            # t in {0, 1}:  z = -x*(2t-1) = x*(1-2t)  and  |z| == |x|,
            # so BCE-with-logits and logsigmoid share a single softplus:
            #   bce   = max(z, 0) + log1p(exp(-|x|))
            #   focal = exp(gamma * (min(z, 0) - log1p(exp(-|x|))))
            # -> 3 transcendentals/element instead of 5.
            z = x * (1.0 - 2.0 * t)
            sp = jnp.log1p(jnp.exp(-jnp.abs(x)))
            bce = jnp.maximum(z, 0.0) + sp
            focal = jnp.exp((jnp.minimum(z, 0.0) - sp) * gamma)
        else:
            # General (non-binary) targets: exact rewrite of the reference.
            #   bce      = max(x,0) - x*t + log1p(exp(-|x|))
            #   invprobs = logsigmoid(-x*(2t-1)) = min(z,0) - log1p(exp(-|z|))
            bce = jnp.maximum(x, 0.0) - x * t + jnp.log1p(jnp.exp(-jnp.abs(x)))
            z = -x * (t * 2.0 - 1.0)
            invprobs = jnp.minimum(z, 0.0) - jnp.log1p(jnp.exp(-jnp.abs(z)))
            focal = jnp.exp(invprobs * gamma)
        return focal * bce

    def block_sum(mask_rows):
        def body(c, acc):
            if n_chunks == 1:
                x, t, base = x_ref[...], t_ref[...], 0
            else:
                start = pl.multiple_of(c * chunk_rows, chunk_rows)
                x = x_ref[pl.ds(start, chunk_rows), :]
                t = t_ref[pl.ds(start, chunk_rows), :]
                base = c * chunk_rows
            loss = chunk_loss(x, t)
            if mask_rows is not None:
                # Only rows < mask_rows carry valid data (ragged last block /
                # small-path padding).  where() masks any garbage/NaN.
                row = base + lax.broadcasted_iota(jnp.int32, loss.shape, 0)
                loss = jnp.where(row < mask_rows, loss, 0.0)
            # Sublane-group fold to (8, 128): pure VPU adds; the final
            # cross-lane reduce happens in the tiny wrapper-side jnp.sum.
            return acc + loss.reshape(
                chunk_rows // SUBLANES, SUBLANES, LANES).sum(axis=0)

        if n_chunks == 1:
            return body(0, zero_acc)
        return lax.fori_loop(0, n_chunks, body, zero_acc, unroll=True)

    if rem_rows is None:
        o_ref[...] = block_sum(None)
    elif num_blocks == 1:
        o_ref[...] = block_sum(rem_rows)
    else:
        last = pl.num_programs(0) - 1

        @pl.when(pl.program_id(0) != last)
        def _():
            o_ref[...] = block_sum(None)

        @pl.when(pl.program_id(0) == last)
        def _():
            o_ref[...] = block_sum(rem_rows)


def _focal_loss_elems(x, t, gamma):
    """Per-element focal loss in plain jnp (used only for the <128-elem tail)."""
    x = x.astype(jnp.float32)
    t = t.astype(jnp.float32)
    bce = jnp.maximum(x, 0.0) - x * t + jnp.log1p(jnp.exp(-jnp.abs(x)))
    z = -x * (t * 2.0 - 1.0)
    invprobs = jnp.minimum(z, 0.0) - jnp.log1p(jnp.exp(-jnp.abs(z)))
    return jnp.exp(invprobs * gamma) * bce


def focal_loss(inputs, targets, gamma, *, binary_targets=False,
               block_rows=DEFAULT_BLOCK_ROWS, chunk_rows=CHUNK_ROWS):
    if inputs.shape != targets.shape:
        raise ValueError(
            "Target size ({}) must be the same as input size ({})".format(
                targets.shape, inputs.shape))

    n_valid = int(inputs.size)
    if n_valid == 0:
        return jnp.float32(jnp.nan)  # torch .mean() of an empty tensor is NaN

    gamma = float(gamma)
    block_rows = _round_up(block_rows, chunk_rows)

    if targets.dtype == jnp.bool_:
        targets = targets.astype(jnp.int8)   # bool refs are awkward; int8 is narrow
        binary_targets = True

    x = inputs.reshape(-1)
    t = targets.reshape(-1)

    rows_main = n_valid // LANES
    tail = n_valid - rows_main * LANES

    # <128-element ragged tail: plain jnp (avoids a full-array pad copy).
    tail_sum = jnp.float32(0.0)
    if tail:
        tail_sum = _focal_loss_elems(x[rows_main * LANES:],
                                     t[rows_main * LANES:], gamma).sum()
    if rows_main == 0:
        return tail_sum / jnp.float32(n_valid)

    x_main = x if tail == 0 else x[: rows_main * LANES]
    t_main = t if tail == 0 else t[: rows_main * LANES]

    rem_rows = None
    if rows_main <= SMALL_ROWS:
        # Single block.  Pad rows to a multiple of 8 (tiny copy, <= 32 KiB)
        # and mask the padded rows in-kernel.
        rows = _round_up(rows_main, SUBLANES)
        if rows != rows_main:
            padn = (rows - rows_main) * LANES
            x_main = jnp.pad(x_main, (0, padn))
            t_main = jnp.pad(t_main, (0, padn))
            rem_rows = rows_main
        br, num_blocks, kchunk, n_chunks = rows, 1, rows, 1
        x2 = x_main.reshape(rows, LANES)
        t2 = t_main.reshape(rows, LANES)
    else:
        # >= 2 blocks so v7x can shard the "parallel" grid axis across both
        # TensorCores; blocks are multiples of the in-kernel chunk size.
        nb = max(2, pl.cdiv(rows_main, block_rows))
        br = min(_round_up(pl.cdiv(rows_main, nb), SUBLANES), block_rows)
        kchunk = min(chunk_rows, br)
        br = _round_up(br, kchunk)
        num_blocks = pl.cdiv(rows_main, br)
        n_chunks = br // kchunk
        if rows_main % br:
            rem_rows = rows_main - (num_blocks - 1) * br
        x2 = x_main.reshape(rows_main, LANES)   # zero-copy when tail == 0
        t2 = t_main.reshape(rows_main, LANES)

    kernel = functools.partial(
        _focal_loss_kernel,
        gamma=gamma,
        chunk_rows=kchunk,
        n_chunks=n_chunks,
        num_blocks=num_blocks,
        rem_rows=rem_rows,
        binary_targets=binary_targets,
    )

    partials = pl.pallas_call(
        kernel,
        out_shape=jax.ShapeDtypeStruct((num_blocks * SUBLANES, LANES),
                                       jnp.float32),
        grid_spec=pltpu.PrefetchScalarGridSpec(
            num_scalar_prefetch=0,
            grid=(num_blocks,),
            in_specs=[
                pl.BlockSpec((br, LANES), lambda i: (i, 0)),
                pl.BlockSpec((br, LANES), lambda i: (i, 0)),
            ],
            out_specs=pl.BlockSpec((SUBLANES, LANES), lambda i: (i, 0)),
        ),
        compiler_params=pltpu.CompilerParams(
            dimension_semantics=("parallel",),
            vmem_limit_bytes=32 * 1024 * 1024,
        ),
    )(x2, t2)

    # Tiny finishing reduction: per-block (8,128) partials + tail -> mean.
    return (jnp.sum(partials) + tail_sum) / jnp.float32(n_valid)


def _focal_loss_ref(inputs, targets, gamma):
    """Direct translation of the PyTorch module (reference)."""
    x = inputs.astype(jnp.float32)
    t = targets.astype(jnp.float32)
    max_val = jnp.maximum(-x, 0.0)
    loss = x - x * t + max_val + jnp.log(jnp.exp(-max_val) + jnp.exp(-x - max_val))
    z = -x * (t * 2.0 - 1.0)
    invprobs = jnp.minimum(z, 0.0) - jnp.log1p(jnp.exp(-jnp.abs(z)))
    loss = jnp.exp(invprobs * gamma) * loss
    return jnp.mean(loss)


if __name__ == "__main__":
    gamma = 2.0  # module __init__ parameter
    key = jax.random.PRNGKey(0)
    k1, k2, k3, k4, k5, k6 = jax.random.split(key, 6)

    # 1) NCHW logits, binary float targets (size % 128 == 0, single block).
    x = jax.random.normal(k1, (2, 4, 16, 16), dtype=jnp.float32)
    t = (jax.random.uniform(k2, (2, 4, 16, 16)) > 0.5).astype(jnp.float32)
    ref = _focal_loss_ref(x, t, gamma)
    out_g = jax.block_until_ready(focal_loss(x, t, gamma))                       # general-t path
    out_b = jax.block_until_ready(focal_loss(x, t, gamma, binary_targets=True))  # shared-softplus path
    assert jnp.allclose(out_g, ref, rtol=1e-5, atol=1e-6), (out_g, ref)
    assert jnp.allclose(out_b, ref, rtol=1e-5, atol=1e-6), (out_b, ref)

    # 2) Ragged size (not a multiple of 128): kernel on the 128-aligned prefix,
    #    <128-element tail handled in plain jnp.
    x2 = jax.random.normal(k3, (3, 5, 7, 11), dtype=jnp.float32)
    t2 = (jax.random.uniform(k4, (3, 5, 7, 11)) > 0.5).astype(jnp.float32)
    out2 = jax.block_until_ready(focal_loss(x2, t2, gamma))
    ref2 = _focal_loss_ref(x2, t2, gamma)
    assert jnp.allclose(out2, ref2, rtol=1e-5, atol=1e-6), (out2, ref2)

    # 3) Multi-block path with a ragged last block (rows % br != 0, pad == 0):
    #    exercises the chunked fori_loop + in-kernel row mask + pl.when.
    x3 = jax.random.normal(k5, (2, 4, 170, 128), dtype=jnp.float32)
    t3 = (jax.random.uniform(k6, (2, 4, 170, 128)) > 0.5).astype(jnp.float32)
    out3 = jax.block_until_ready(focal_loss(x3, t3, gamma, binary_targets=True))
    ref3 = _focal_loss_ref(x3, t3, gamma)
    assert jnp.allclose(out3, ref3, rtol=1e-5, atol=1e-6), (out3, ref3)

    print("KERNEL_OK")
</pallas_src>

<mosaic_0001>
module attributes {stable_mosaic.version = 11 : i64} {
  func.func @_focal_loss_kernel(%arg0: i32, %arg1: memref<16x128xf32, #tpu.memory_space<vmem>>, %arg2: memref<16x128xf32, #tpu.memory_space<vmem>>, %arg3: memref<8x128xf32, #tpu.memory_space<vmem>>) attributes {dimension_semantics = [#tpu.dimension_semantics<parallel>], iteration_bounds = array<i64: 1>, scalar_prefetch = 0 : i64, scratch_operands = 0 : i64, tpu.core_type = #tpu.core_type<tc>, window_params = [{transform_indices = @transform_0, window_bounds = array<i64: 16, 128>}, {transform_indices = @transform_1, window_bounds = array<i64: 16, 128>}, {transform_indices = @transform_2, window_bounds = array<i64: 8, 128>}]} {
    %cst = arith.constant 0.000000e+00 : f32
    %0 = vector.broadcast %cst : f32 to vector<8x128xf32>
    %c0 = arith.constant 0 : index
    %c0_0 = arith.constant 0 : index
    %1 = vector.load %arg1[%c0, %c0_0] : memref<16x128xf32, #tpu.memory_space<vmem>>, vector<16x128xf32>
    %c0_1 = arith.constant 0 : index
    %c0_2 = arith.constant 0 : index
    %2 = vector.load %arg2[%c0_1, %c0_2] : memref<16x128xf32, #tpu.memory_space<vmem>>, vector<16x128xf32>
    %cst_3 = arith.constant 0.000000e+00 : f32
    %3 = vector.broadcast %cst_3 : f32 to vector<16x128xf32>
    %4 = arith.maximumf %1, %3 : vector<16x128xf32>
    %5 = arith.mulf %1, %2 : vector<16x128xf32>
    %6 = arith.subf %4, %5 : vector<16x128xf32>
    %7 = math.absf %1 : vector<16x128xf32>
    %cst_4 = arith.constant 0.000000e+00 : f32
    %8 = vector.broadcast %cst_4 : f32 to vector<16x128xf32>
    %9 = arith.subf %8, %7 : vector<16x128xf32>
    %10 = math.exp %9 : vector<16x128xf32>
    %11 = math.log1p %10 : vector<16x128xf32>
    %12 = arith.addf %6, %11 : vector<16x128xf32>
    %cst_5 = arith.constant 0.000000e+00 : f32
    %13 = vector.broadcast %cst_5 : f32 to vector<16x128xf32>
    %14 = arith.subf %13, %1 : vector<16x128xf32>
    %cst_6 = arith.constant 2.000000e+00 : f32
    %15 = vector.broadcast %cst_6 : f32 to vector<16x128xf32>
    %16 = arith.mulf %2, %15 : vector<16x128xf32>
    %cst_7 = arith.constant 1.000000e+00 : f32
    %17 = vector.broadcast %cst_7 : f32 to vector<16x128xf32>
    %18 = arith.subf %16, %17 : vector<16x128xf32>
    %19 = arith.mulf %14, %18 : vector<16x128xf32>
    %cst_8 = arith.constant 0.000000e+00 : f32
    %20 = vector.broadcast %cst_8 : f32 to vector<16x128xf32>
    %21 = arith.minimumf %19, %20 : vector<16x128xf32>
    %22 = math.absf %19 : vector<16x128xf32>
    %cst_9 = arith.constant 0.000000e+00 : f32
    %23 = vector.broadcast %cst_9 : f32 to vector<16x128xf32>
    %24 = arith.subf %23, %22 : vector<16x128xf32>
    %25 = math.exp %24 : vector<16x128xf32>
    %26 = math.log1p %25 : vector<16x128xf32>
    %27 = arith.subf %21, %26 : vector<16x128xf32>
    %cst_10 = arith.constant 2.000000e+00 : f32
    %28 = vector.broadcast %cst_10 : f32 to vector<16x128xf32>
    %29 = arith.mulf %27, %28 : vector<16x128xf32>
    %30 = math.exp %29 : vector<16x128xf32>
    %31 = arith.mulf %30, %12 : vector<16x128xf32>
    %32 = vector.shape_cast %31 : vector<16x128xf32> to vector<2x8x128xf32>
    %cst_11 = arith.constant dense<0.000000e+00> : vector<8x128xf32>
    %33 = vector.multi_reduction <add>, %32, %cst_11 [0] : vector<2x8x128xf32> to vector<8x128xf32>
    %34 = arith.addf %0, %33 : vector<8x128xf32>
    %c0_12 = arith.constant 0 : index
    %c0_13 = arith.constant 0 : index
    %35 = vector.load %arg3[%c0_12, %c0_13] : memref<8x128xf32, #tpu.memory_space<vmem>>, vector<8x128xf32>
    tpu.vector_store %arg3[%c0_12, %c0_13], %34 {strides = array<i32>} : memref<8x128xf32, #tpu.memory_space<vmem>>, vector<8x128xf32>,
    return
  }
  func.func @transform_0(%arg0: i32) -> (i32, i32) {
    %c0_i32 = arith.constant 0 : i32
    %c0_i32_0 = arith.constant 0 : i32
    return %arg0, %c0_i32 : i32, i32
  }
  func.func @transform_1(%arg0: i32) -> (i32, i32) {
    %c0_i32 = arith.constant 0 : i32
    %c0_i32_0 = arith.constant 0 : i32
    return %arg0, %c0_i32 : i32, i32
  }
  func.func @transform_2(%arg0: i32) -> (i32, i32) {
    %c0_i32 = arith.constant 0 : i32
    %c0_i32_0 = arith.constant 0 : i32
    return %arg0, %c0_i32 : i32, i32
  }
}

</mosaic_0001>

<bundles_post_ra>
// kernel: tpu_custom_call.1
= control target key start
LH: loop header
LB: loop body
LE: loop exit
PB: predicated region body
PF: predicated region fallthrough
CT: control target
= control target key end

     0   :  { %7 = vsyncpa [#allocation3], 0  ;;  %s285_s0 = inlined_call_operand.hbm [shape: f32[16,128], index: 0, kind: input, shape index: {}]   ;;  %s286_s1 = inlined_call_operand.hbm [shape: f32[16,128], index: 1, kind: input, shape index: {}]   ;;  %s287_s2 = inlined_call_operand.hbm [shape: f32[8,128], index: 2, kind: output, shape index: {}]  }
   0x1   :  { %8 = vsyncpa [#allocation6], 0 }
   0x2   :  { %9 = vsyncpa [#allocation4], 0  ;;  %s236_s9 = smov [#allocation2]  }
   0x3   :  { %s15_s10 = sshll.u32 %s236_s9, 4  ;;  %s16_s10 = int_to_ptr.vmem [resolvable:$true] %s15_s10 }
   0x4   :  { %s178_s11 = scalar_lea.vmem %s16_s10, 256  ;;  %p183_p1 = scmp.lt.s32.totalorder %s16_s10, %s16_s10 }
   0x5   :  { %p179_p0 = scmp.ne.s32.totalorder %s16_s10, %s178_s11  ;;  %p184_p2 = scmp.lt.s32.totalorder %s178_s11, %s178_s11 }
   0x7   :  { %p185_p3 = por %p184_p2, %p183_p1 }
   0x9   :  { %p186_p4 = pnand %p185_p3, %p179_p0 }
   0xb   :  { %189 = shalt.err (!%p186_p4)
}
   0xc   :  { %s237_s12 = smov 128   ;;  %s238_s13 = smov 8  }
   0xd   :  { %21 = dma.hbm_to_vmem [thread:$0]  %s285_s0, 256, %s16_s10, [#allocation3], %s237_s12, %s237_s12, %s238_s13  }
   0xe   :  { %s239_s16 = smov [#allocation5]  }
   0xf   :  { %s27_s17 = sshll.u32 %s239_s16, 4  ;;  %s28_s17 = int_to_ptr.vmem [resolvable:$true] %s27_s17 }
  0x10   :  { %s198_s18 = scalar_lea.vmem %s28_s17, 256  ;;  %p203_p6 = scmp.lt.s32.totalorder %s28_s17, %s28_s17 }
  0x11   :  { %p199_p5 = scmp.ne.s32.totalorder %s28_s17, %s198_s18  ;;  %p204_p7 = scmp.lt.s32.totalorder %s198_s18, %s198_s18 }
  0x13   :  { %p205_p8 = por %p204_p7, %p203_p6 }
  0x15   :  { %p206_p9 = pnand %p205_p8, %p199_p5 }
  0x17   :  { %209 = shalt.err (!%p206_p9)
}
  0x18   :  { %33 = dma.hbm_to_vmem [thread:$0]  %s286_s1, 256, %s28_s17, [#allocation6], %s237_s12, %s237_s12, %s238_s13  }
  0x19   :  { %230 = dma.done.wait [#allocation3], 256  }
  0x1a   :  { %231 = vsyncadd [#allocation3], 4294967040 }
  0x1b   :  { %232 = dma.done.wait [#allocation6], 256  }
  0x1c   :  { %233 = vsyncadd [#allocation6], 4294967040  ;;  %v262_v0 = vld [vmem:[#allocation2] sm:$0xff]  ;;  %v264_v1 = vld [vmem:[#allocation2 + $0x8] sm:$0xff]  ;;  %s240_s0 = smov [#allocation7]  }
  0x1d   :  { %v266_v2 = vld [vmem:[#allocation5] sm:$0xff]  ;;  %v268_v3 = vld [vmem:[#allocation5 + $0x8] sm:$0xff]  ;;  %v78_v4 = vsub.f32 0.0, %v262_v0  ;;  %v79_v5 = vsub.f32 0.0, %v264_v1  ;;  %v50_v12 = vand.u32 2147483647, %v262_v0 }
  0x1e   :  { %v80_v6 = vmul.f32 2.0, %v266_v2  ;;  %v81_v7 = vmul.f32 2.0, %v268_v3  ;;  %v51_v15 = vand.u32 2147483647, %v264_v1  ;;  %v44_v62 = vmax.f32 %v262_v0, 0.0  ;;  %s133_s1 = sshll.u32 %s240_s0, 4  ;;  %s134_s1 = int_to_ptr.vmem [resolvable:$true] %s133_s1 }
  0x1f   :  { %v52_v18 = vsub.f32 0.0, %v50_v12  ;;  %v46_v63 = vmul.f32 %v266_v2, %v262_v0  ;;  %s210_s21 = scalar_lea.vmem %s134_s1, 128  ;;  %p215_p11 = scmp.lt.s32.totalorder %s134_s1, %s134_s1 }
  0x20   :  { %v143_v8 = vadd.f32 -1.0, %v80_v6  ;;  %v144_v9 = vadd.f32 -1.0, %v81_v7  ;;  %v53_v21 = vsub.f32 0.0, %v51_v15  ;;  %p211_p10 = scmp.ne.s32.totalorder %s134_s1, %s210_s21  ;;  %p216_p12 = scmp.lt.s32.totalorder %s210_s21, %s210_s21 }
  0x21   :  { %v54_v22 = vmul.f32 1.442695, %v52_v18 }
  0x22   :  { %v84_v10 = vmul.f32 %v143_v8, %v78_v4  ;;  %v85_v11 = vmul.f32 %v144_v9, %v79_v5  ;;  %v56_v23 = vmul.f32 1.442695, %v53_v21  ;;  %v45_v4 = vmax.f32 %v264_v1, 0.0  ;;  %p217_p13 = por %p216_p12, %p215_p11 }
  0x23   :  { %v47_v5 = vmul.f32 %v268_v3, %v264_v1 }
  0x24   :  { %v88_v13 = vand.u32 2147483647, %v84_v10  ;;  %v89_v14 = vand.u32 2147483647, %v85_v11  ;;  %v86_v40 = vmin.f32 %v84_v10, 0.0  ;;  %v87_v43 = vmin.f32 %v85_v11, 0.0  ;;  %p218_p0 = pnand %p217_p13, %p211_p10 }
  0x25   :  { %v48_v10 = vsub.f32 %v44_v62, %v46_v63  ;;  %v49_v11 = vsub.f32 %v45_v4, %v47_v5 }
  0x26   :  { %v90_v16 = vsub.f32 0.0, %v88_v13  ;;  %v91_v17 = vsub.f32 0.0, %v89_v14 }
  0x28   :  { %v92_v19 = vmul.f32 1.442695, %v90_v16  ;;  %v94_v20 = vmul.f32 1.442695, %v91_v17 }
  0x2a   :  { %150 = vpow2.f32 %v92_v19 }
  0x2b   :  { %152 = vpow2.f32 %v94_v20 }
  0x2c   :  { %154 = vpow2.f32 %v54_v22 }
  0x2d   :  { %156 = vpow2.f32 %v56_v23 }
  0x37   :  { %v151_v24 = vpop.eup %150 }
  0x38   :  { %v153_v25 = vpop.eup %152  ;;  %v96_v26 = vadd.f32 1.0, %v151_v24  ;;  %v99_v30 = vmul.f32 -0.5, %v151_v24  ;;  %v102_v35 = vand.u32 2147483647, %v151_v24 }
  0x39   :  { %v105_v27 = vadd.f32 1.0, %v153_v25  ;;  %v155_v28 = vpop.eup %154  ;;  %v108_v31 = vmul.f32 -0.5, %v153_v25  ;;  %v111_v37 = vand.u32 2147483647, %v153_v25 }
  0x3a   :  { %158 = vlog2.f32 %v96_v26  ;;  %v157_v29 = vpop.eup %156  ;;  %v58_v32 = vadd.f32 1.0, %v155_v28  ;;  %v100_v34 = vadd.f32 1.0, %v99_v30  ;;  %vm103_vm0 = vcmp.lt.f32.partialorder %v102_v35, 0.0004427343 }
  0x3b   :  { %160 = vlog2.f32 %v105_v27  ;;  %v67_v33 = vadd.f32 1.0, %v157_v29  ;;  %v109_v36 = vadd.f32 1.0, %v108_v31  ;;  %vm112_vm1 = vcmp.lt.f32.partialorder %v111_v37, 0.0004427343 }
  0x3c   :  { %162 = vlog2.f32 %v58_v32  ;;  %v101_v38 = vmul.f32 %v151_v24, %v100_v34  ;;  %v61_v49 = vmul.f32 -0.5, %v155_v28  ;;  %v70_v51 = vmul.f32 -0.5, %v157_v29 }
  0x3d   :  { %164 = vlog2.f32 %v67_v33  ;;  %v110_v41 = vmul.f32 %v153_v25, %v109_v36  ;;  %v64_v58 = vand.u32 2147483647, %v155_v28  ;;  %v73_v61 = vand.u32 2147483647, %v157_v29 }
  0x3e   :  { %v62_v55 = vadd.f32 1.0, %v61_v49  ;;  %v71_v59 = vadd.f32 1.0, %v70_v51 }
  0x3f   :  { %vm65_vm2 = vcmp.lt.f32.partialorder %v64_v58, 0.0004427343  ;;  %vm74_vm3 = vcmp.lt.f32.partialorder %v73_v61, 0.0004427343 }
  0x40   :  { %v63_v7 = vmul.f32 %v155_v28, %v62_v55  ;;  %v72_v9 = vmul.f32 %v157_v29, %v71_v59 }
  0x47   :  { %v159_v39 = vpop.eup %158 }
  0x48   :  { %v161_v42 = vpop.eup %160  ;;  %v98_v44 = vmul.f32 0.6931472, %v159_v39 }
  0x49   :  { %v107_v45 = vmul.f32 0.6931472, %v161_v42  ;;  %v163_v57 = vpop.eup %162 }
  0x4a   :  { %v104_v46 = vsel %vm103_vm0, %v101_v38, %v98_v44  ;;  %v165_v60 = vpop.eup %164  ;;  %v60_v6 = vmul.f32 0.6931472, %v163_v57 }
  0x4b   :  { %v113_v47 = vsel %vm112_vm1, %v110_v41, %v107_v45  ;;  %v114_v48 = vsub.f32 %v86_v40, %v104_v46  ;;  %v69_v8 = vmul.f32 0.6931472, %v165_v60 }
  0x4c   :  { %v115_v50 = vsub.f32 %v87_v43, %v113_v47  ;;  %v66_v12 = vsel %vm65_vm2, %v63_v7, %v60_v6 }
  0x4d   :  { %v116_v52 = vmul.f32 2.0, %v114_v48  ;;  %v75_v13 = vsel %vm74_vm3, %v72_v9, %v69_v8  ;;  %v76_v14 = vadd.f32 %v66_v12, %v48_v10 }
  0x4e   :  { %v117_v53 = vmul.f32 2.0, %v115_v50  ;;  %v77_v15 = vadd.f32 %v75_v13, %v49_v11 }
  0x4f   :  { %v118_v54 = vmul.f32 1.442695, %v116_v52 }
  0x50   :  { %v120_v56 = vmul.f32 1.442695, %v117_v53 }
  0x51   :  { %166 = vpow2.f32 %v118_v54 }
  0x52   :  { %168 = vpow2.f32 %v120_v56 }
  0x5e   :  { %v167_v16 = vpop.eup %166 }
  0x5f   :  { %v169_v17 = vpop.eup %168  ;;  %v122_v0 = vmul.f32 %v167_v16, %v76_v14 }
  0x60   :  { %v123_v2 = vmul.f32 %v169_v17, %v77_v15 }
  0x62   :  { %v124_v18 = vadd.f32 %v123_v2, %v122_v0 }
  0x64   :  { %126 = vst [vmem:[#allocation7] sm:$0xff] %v124_v18 }
  0x65   :  { %221 = shalt.err (!%p218_p0)
}
  0x66   :  { %136 = dma.vmem_to_hbm [thread:$0]  %s134_s1, 128, %s287_s2, [#allocation4]  }
  0x67   :  { %234 = dma.done.wait [#allocation4], 128  }
  0x68   :  { %235 = vsyncadd [#allocation4], 4294967168 }
  0x69   :  { %140 = vsyncpa [#allocation3], 1 }
  0x6a   :  { %141 = vsyncpa [#allocation6], 1 }
  0x6b   :  { %142 = vsyncpa [#allocation4], 1 }

</bundles_post_ra>
